<compile_context>
chip_gen: v5e
topology: v5e:2x2
jax: 0.10.0
libtpu: 0.0.40
codegen_flags: <defaults>
</compile_context>

<pallas_src>
import functools
import math

import jax
import jax.numpy as jnp
import numpy as np
from jax.experimental import pallas as pl
from jax.experimental.pallas import tpu as pltpu

_HP = jax.lax.Precision.HIGHEST


# ---------------------------------------------------------------------------
# Kernel bodies
# ---------------------------------------------------------------------------
def _linear_kernel(*refs, do_ln: bool, has_res: bool, eps: float):
    """[optional LayerNorm] -> x @ W [-> + residual]."""
    it = iter(refs)
    x_ref = next(it)
    g_ref = next(it) if do_ln else None
    b_ref = next(it) if do_ln else None
    w_ref = next(it)
    r_ref = next(it) if has_res else None
    o_ref = next(it)

    x = x_ref[...].astype(jnp.float32)
    if do_ln:
        mu = jnp.mean(x, axis=-1, keepdims=True)
        var = jnp.mean(jnp.square(x - mu), axis=-1, keepdims=True)
        x = (x - mu) * jax.lax.rsqrt(var + eps)
        x = x * g_ref[...].astype(jnp.float32) + b_ref[...].astype(jnp.float32)

    y = jnp.dot(x, w_ref[...].astype(jnp.float32),
                preferred_element_type=jnp.float32, precision=_HP)
    if has_res:
        y = y + r_ref[...].astype(jnp.float32)
    o_ref[...] = y.astype(o_ref.dtype)


def _attention_kernel(q_ref, k_ref, v_ref, *rest, has_mask: bool, scale: float):
    """softmax(q k^T * scale + mask_bias) @ v for one (batch, head)."""
    if has_mask:
        m_ref, o_ref, p_ref = rest
    else:
        o_ref, p_ref = rest

    q = q_ref[...].astype(jnp.float32)          # (Sq, dk)
    k = k_ref[...].astype(jnp.float32)          # (Sk, dk)
    v = v_ref[...].astype(jnp.float32)          # (Sk, dk)

    # q @ k^T via dot_general (contract last dims) -> (Sq, Sk)
    s = jax.lax.dot_general(q, k, (((1,), (1,)), ((), ())),
                            preferred_element_type=jnp.float32,
                            precision=_HP) * scale
    if has_mask:
        s = s + m_ref[...].astype(jnp.float32)  # additive -1e30 on masked slots

    s = s - jnp.max(s, axis=-1, keepdims=True)
    e = jnp.exp(s)
    p = e / jnp.sum(e, axis=-1, keepdims=True)
    # TODO(synk): attention-prob dropout (train mode) omitted (eval semantics).

    o = jnp.dot(p, v, preferred_element_type=jnp.float32, precision=_HP)
    o_ref[...] = o.astype(o_ref.dtype)
    p_ref[...] = p.astype(p_ref.dtype)


def _ffn_kernel(x_ref, g_ref, b_ref, w1_ref, b1_ref, w2_ref, b2_ref, o_ref, *, eps: float):
    """x + W2 @ relu(W1 @ LayerNorm(x) + b1) + b2, fully fused per row tile."""
    x = x_ref[...].astype(jnp.float32)
    mu = jnp.mean(x, axis=-1, keepdims=True)
    var = jnp.mean(jnp.square(x - mu), axis=-1, keepdims=True)
    h = (x - mu) * jax.lax.rsqrt(var + eps)
    h = h * g_ref[...].astype(jnp.float32) + b_ref[...].astype(jnp.float32)

    inter = jnp.dot(h, w1_ref[...].astype(jnp.float32),
                    preferred_element_type=jnp.float32, precision=_HP)
    inter = jnp.maximum(inter + b1_ref[...].astype(jnp.float32), 0.0)
    # TODO(synk): FFN dropout_1 (train mode) omitted (eval semantics).

    y = jnp.dot(inter, w2_ref[...].astype(jnp.float32),
                preferred_element_type=jnp.float32, precision=_HP)
    y = y + b2_ref[...].astype(jnp.float32) + x
    o_ref[...] = y.astype(o_ref.dtype)


# ---------------------------------------------------------------------------
# Pallas-call wrappers
# ---------------------------------------------------------------------------
def _row_tile(M: int, max_rows: int = 256) -> int:
    # Tile the token axis so VMEM stays bounded and the grid pipelines; fall
    # back to the full extent for small / non-multiple-of-8 row counts.
    return max_rows if (M % 8 == 0 and M > max_rows) else M


def fused_linear(x, w, *, ln=None, residual=None, eps=1e-6, block_rows=256):
    """y = [LayerNorm(x)] @ w [+ residual].  x:(M,K), w:(K,N)."""
    M, K = x.shape
    K2, N = w.shape
    assert K == K2
    do_ln = ln is not None
    has_res = residual is not None
    tm = _row_tile(M, block_rows)
    grid = (pl.cdiv(M, tm),)

    in_specs = [pl.BlockSpec((tm, K), lambda i: (i, 0))]
    args = [x]
    if do_ln:
        g, b = ln
        in_specs += [pl.BlockSpec((1, K), lambda i: (0, 0)),
                     pl.BlockSpec((1, K), lambda i: (0, 0))]
        args += [g.reshape(1, K), b.reshape(1, K)]
    in_specs.append(pl.BlockSpec((K, N), lambda i: (0, 0)))
    args.append(w)
    if has_res:
        in_specs.append(pl.BlockSpec((tm, N), lambda i: (i, 0)))
        args.append(residual)

    kernel = functools.partial(_linear_kernel, do_ln=do_ln, has_res=has_res, eps=eps)
    bytes_acc = 4 * (M * K + K * N + M * N
                     + (M * N if has_res else 0) + (2 * K if do_ln else 0))
    return pl.pallas_call(
        kernel,
        out_shape=jax.ShapeDtypeStruct((M, N), x.dtype),
        grid=grid,
        in_specs=in_specs,
        out_specs=pl.BlockSpec((tm, N), lambda i: (i, 0)),
        compiler_params=pltpu.CompilerParams(dimension_semantics=("parallel",)),
        cost_estimate=pl.CostEstimate(flops=2 * M * K * N, transcendentals=0,
                                      bytes_accessed=bytes_acc),
    )(*args)


def mha_attention(q, k, v, mask_bias=None):
    """q,k,v: (B, H, S, d_k); mask_bias: (B, Sq, Sk) additive or None.

    Returns (context (B,H,Sq,d_k), attn_probs (B,H,Sq,Sk))."""
    B, H, Sq, dk = q.shape
    Sk = k.shape[2]
    scale = 1.0 / math.sqrt(dk)
    has_mask = mask_bias is not None

    q_spec = pl.BlockSpec((pl.Squeezed(), pl.Squeezed(), Sq, dk),
                          lambda b, h: (b, h, 0, 0))
    kv_spec = pl.BlockSpec((pl.Squeezed(), pl.Squeezed(), Sk, dk),
                           lambda b, h: (b, h, 0, 0))
    p_spec = pl.BlockSpec((pl.Squeezed(), pl.Squeezed(), Sq, Sk),
                          lambda b, h: (b, h, 0, 0))

    in_specs = [q_spec, kv_spec, kv_spec]
    args = [q, k, v]
    if has_mask:
        in_specs.append(pl.BlockSpec((pl.Squeezed(), Sq, Sk), lambda b, h: (b, 0, 0)))
        args.append(mask_bias)

    kernel = functools.partial(_attention_kernel, has_mask=has_mask, scale=scale)
    flops = 4 * B * H * Sq * Sk * dk
    bytes_acc = 4 * (B * H * (Sq * dk + 2 * Sk * dk + Sq * dk + Sq * Sk)
                     + (B * Sq * Sk if has_mask else 0))
    return pl.pallas_call(
        kernel,
        out_shape=(jax.ShapeDtypeStruct((B, H, Sq, dk), q.dtype),
                   jax.ShapeDtypeStruct((B, H, Sq, Sk), jnp.float32)),
        grid=(B, H),
        in_specs=in_specs,
        out_specs=(q_spec, p_spec),
        compiler_params=pltpu.CompilerParams(
            dimension_semantics=("parallel", "parallel")),
        cost_estimate=pl.CostEstimate(flops=flops, transcendentals=B * H * Sq * Sk,
                                      bytes_accessed=bytes_acc),
    )(*args)


def ffn_forward(x, g, b, w1, b1, w2, b2, *, eps=1e-6, block_rows=256):
    """Fused FFN block with pre-LayerNorm and residual.  x: (M, D)."""
    M, D = x.shape
    F = w1.shape[1]
    tm = _row_tile(M, block_rows)
    grid = (pl.cdiv(M, tm),)
    return pl.pallas_call(
        functools.partial(_ffn_kernel, eps=eps),
        out_shape=jax.ShapeDtypeStruct((M, D), x.dtype),
        grid=grid,
        in_specs=[
            pl.BlockSpec((tm, D), lambda i: (i, 0)),
            pl.BlockSpec((1, D), lambda i: (0, 0)),
            pl.BlockSpec((1, D), lambda i: (0, 0)),
            pl.BlockSpec((D, F), lambda i: (0, 0)),
            pl.BlockSpec((1, F), lambda i: (0, 0)),
            pl.BlockSpec((F, D), lambda i: (0, 0)),
            pl.BlockSpec((1, D), lambda i: (0, 0)),
        ],
        out_specs=pl.BlockSpec((tm, D), lambda i: (i, 0)),
        compiler_params=pltpu.CompilerParams(dimension_semantics=("parallel",)),
        cost_estimate=pl.CostEstimate(flops=4 * M * D * F, transcendentals=0,
                                      bytes_accessed=4 * (2 * M * D + 2 * D * F + M * F)),
    )(x, g.reshape(1, D), b.reshape(1, D), w1, b1.reshape(1, F), w2, b2.reshape(1, D))


# ---------------------------------------------------------------------------
# DecoderLayer forward (glue: reshapes / head split-merge in plain JAX)
# ---------------------------------------------------------------------------
def decoder_layer_forward(params, label_emb, enc_out, tgt_mask=None, src_mask=None,
                          eps=1e-6):
    B, Sq, D = label_emb.shape
    Sk = enc_out.shape[1]
    H = params["n_head"]
    dk = D // H

    x = label_emb.reshape(B * Sq, D)  # residual stream, (tokens, d_model)

    # ---------- self attention: LN1 fused into stacked QKV projection ----------
    w_qkv = jnp.concatenate([params["slf_wq"], params["slf_wk"], params["slf_wv"]], axis=1)
    qkv = fused_linear(x, w_qkv, ln=(params["ln1_g"], params["ln1_b"]), eps=eps)   # (B*Sq, 3D)
    qkv = qkv.reshape(B, Sq, 3, H, dk).transpose(2, 0, 3, 1, 4)                    # (3,B,H,Sq,dk)
    q, k, v = qkv[0], qkv[1], qkv[2]

    tgt_bias = None
    if tgt_mask is not None:
        tgt_bias = jnp.where(tgt_mask, jnp.float32(-1e30), jnp.float32(0.0))
    slf_ctx, slf_attn = mha_attention(q, k, v, tgt_bias)                           # (B,H,Sq,dk)
    slf_cat = slf_ctx.transpose(0, 2, 1, 3).reshape(B * Sq, D)
    # output projection fused with residual add (norm_dropout == identity, eval)
    x = fused_linear(slf_cat, params["slf_wfc"], residual=x)

    # ---------- encoder-decoder attention ----------
    q2 = fused_linear(x, params["ed_wq"], ln=(params["ln2_g"], params["ln2_b"]), eps=eps)
    w_kv = jnp.concatenate([params["ed_wk"], params["ed_wv"]], axis=1)             # (D, 2D)
    kv2 = fused_linear(enc_out.reshape(B * Sk, D), w_kv)                           # (B*Sk, 2D)
    q2 = q2.reshape(B, Sq, H, dk).transpose(0, 2, 1, 3)
    kv2 = kv2.reshape(B, Sk, 2, H, dk).transpose(2, 0, 3, 1, 4)
    k2, v2 = kv2[0], kv2[1]

    src_bias = None
    if src_mask is not None:
        src_bias = jnp.where(src_mask, jnp.float32(-1e30), jnp.float32(0.0))
    ed_ctx, ed_attn = mha_attention(q2, k2, v2, src_bias)
    ed_cat = ed_ctx.transpose(0, 2, 1, 3).reshape(B * Sq, D)
    x = fused_linear(ed_cat, params["ed_wfc"], residual=x)

    # ---------- feed-forward ----------
    out = ffn_forward(x, params["ffn_ln_g"], params["ffn_ln_b"],
                      params["ffn_w1"], params["ffn_b1"],
                      params["ffn_w2"], params["ffn_b2"], eps=eps)
    return out.reshape(B, Sq, D), slf_attn, ed_attn


# ---------------------------------------------------------------------------
# Pure-JAX reference (mirrors the PyTorch module in eval mode)
# ---------------------------------------------------------------------------
def reference_decoder_layer(params, label_emb, enc_out, tgt_mask=None, src_mask=None,
                            eps=1e-6):
    H = params["n_head"]

    def ln(x, g, b):
        mu = jnp.mean(x, -1, keepdims=True)
        var = jnp.mean(jnp.square(x - mu), -1, keepdims=True)
        return (x - mu) * jax.lax.rsqrt(var + eps) * g + b

    def mha(q_in, kv_in, wq, wk, wv, wfc, mask):
        B, Sq, D = q_in.shape
        Sk = kv_in.shape[1]
        dk = D // H
        q = jnp.einsum("bsd,de->bse", q_in, wq, precision=_HP).reshape(B, Sq, H, dk).transpose(0, 2, 1, 3)
        k = jnp.einsum("bsd,de->bse", kv_in, wk, precision=_HP).reshape(B, Sk, H, dk).transpose(0, 2, 1, 3)
        v = jnp.einsum("bsd,de->bse", kv_in, wv, precision=_HP).reshape(B, Sk, H, dk).transpose(0, 2, 1, 3)
        scores = jnp.einsum("bhqd,bhkd->bhqk", q, k, precision=_HP) / math.sqrt(dk)
        if mask is not None:
            scores = jnp.where(mask[:, None, :, :], jnp.float32(-1e30), scores)
        p = jax.nn.softmax(scores, axis=-1)
        o = jnp.einsum("bhqk,bhkd->bhqd", p, v, precision=_HP)
        o = o.transpose(0, 2, 1, 3).reshape(B, Sq, D)
        return jnp.einsum("bsd,de->bse", o, wfc, precision=_HP), p

    x = label_emb
    xn = ln(x, params["ln1_g"], params["ln1_b"])
    slf_out, slf_p = mha(xn, xn, params["slf_wq"], params["slf_wk"],
                         params["slf_wv"], params["slf_wfc"], tgt_mask)
    x = x + slf_out
    xn = ln(x, params["ln2_g"], params["ln2_b"])
    ed_out, ed_p = mha(xn, enc_out, params["ed_wq"], params["ed_wk"],
                       params["ed_wv"], params["ed_wfc"], src_mask)
    x = x + ed_out
    xn = ln(x, params["ffn_ln_g"], params["ffn_ln_b"])
    inter = jax.nn.relu(jnp.einsum("bsd,df->bsf", xn, params["ffn_w1"], precision=_HP)
                        + params["ffn_b1"])
    out = jnp.einsum("bsf,fd->bsd", inter, params["ffn_w2"], precision=_HP) \
        + params["ffn_b2"] + x
    return out, slf_p, ed_p


# ---------------------------------------------------------------------------
# Test
# ---------------------------------------------------------------------------
if __name__ == "__main__":
    B, Sq, Sk = 2, 8, 16          # batch, decoder seq, encoder seq
    D, H, F = 32, 4, 64           # d_model, n_head, d_ff

    key = jax.random.PRNGKey(0)
    ks = jax.random.split(key, 22)

    def nrm(k, shape, scale=0.2):
        return scale * jax.random.normal(k, shape, dtype=jnp.float32)

    params = {
        "n_head": H,
        "ln1_g": 1.0 + 0.1 * jax.random.normal(ks[0], (D,), jnp.float32),
        "ln1_b": nrm(ks[1], (D,)),
        "slf_wq": nrm(ks[2], (D, D)), "slf_wk": nrm(ks[3], (D, D)),
        "slf_wv": nrm(ks[4], (D, D)), "slf_wfc": nrm(ks[5], (D, D)),
        "ln2_g": 1.0 + 0.1 * jax.random.normal(ks[6], (D,), jnp.float32),
        "ln2_b": nrm(ks[7], (D,)),
        "ed_wq": nrm(ks[8], (D, D)), "ed_wk": nrm(ks[9], (D, D)),
        "ed_wv": nrm(ks[10], (D, D)), "ed_wfc": nrm(ks[11], (D, D)),
        "ffn_ln_g": 1.0 + 0.1 * jax.random.normal(ks[12], (D,), jnp.float32),
        "ffn_ln_b": nrm(ks[13], (D,)),
        "ffn_w1": nrm(ks[14], (D, F)), "ffn_b1": nrm(ks[15], (F,)),
        "ffn_w2": nrm(ks[16], (F, D)), "ffn_b2": nrm(ks[17], (D,)),
    }

    label_emb = jax.random.normal(ks[18], (B, Sq, D), dtype=jnp.float32)
    enc_out = jax.random.normal(ks[19], (B, Sk, D), dtype=jnp.float32)

    # causal target mask (True = masked), broadcast over heads like the module
    causal = jnp.triu(jnp.ones((Sq, Sq), dtype=jnp.int32), k=1).astype(bool)
    tgt_mask = jnp.broadcast_to(causal[None], (B, Sq, Sq))
    src_mask = None  # exercise the mask-free path for encoder-decoder attention

    out, slf_attn, ed_attn = decoder_layer_forward(
        params, label_emb, enc_out, tgt_mask, src_mask)
    out = jax.block_until_ready(out)

    ref_out, ref_slf, ref_ed = reference_decoder_layer(
        params, label_emb, enc_out, tgt_mask, src_mask)

    np.testing.assert_allclose(np.asarray(out), np.asarray(ref_out), rtol=1e-4, atol=1e-4)
    np.testing.assert_allclose(np.asarray(slf_attn), np.asarray(ref_slf), rtol=1e-4, atol=1e-4)
    np.testing.assert_allclose(np.asarray(ed_attn), np.asarray(ref_ed), rtol=1e-4, atol=1e-4)

    print("KERNEL_OK")
</pallas_src>

<mosaic_0001>
module attributes {stable_mosaic.version = 11 : i64} {
  func.func @_linear_kernel(%arg0: i32, %arg1: memref<16x32xf32, #tpu.memory_space<vmem>>, %arg2: memref<1x32xf32, #tpu.memory_space<vmem>>, %arg3: memref<1x32xf32, #tpu.memory_space<vmem>>, %arg4: memref<32x96xf32, #tpu.memory_space<vmem>>, %arg5: memref<16x96xf32, #tpu.memory_space<vmem>>) attributes {dimension_semantics = [#tpu.dimension_semantics<parallel>], iteration_bounds = array<i64: 1>, scalar_prefetch = 0 : i64, scratch_operands = 0 : i64, tpu.core_type = #tpu.core_type<tc>, window_params = [{transform_indices = @transform_0, window_bounds = array<i64: 16, 32>}, {pipeline_mode = #tpu.pipeline_mode<synchronous>, transform_indices = @transform_1, window_bounds = array<i64: 1, 32>}, {pipeline_mode = #tpu.pipeline_mode<synchronous>, transform_indices = @transform_2, window_bounds = array<i64: 1, 32>}, {pipeline_mode = #tpu.pipeline_mode<synchronous>, transform_indices = @transform_3, window_bounds = array<i64: 32, 96>}, {transform_indices = @transform_4, window_bounds = array<i64: 16, 96>}]} {
    %c0 = arith.constant 0 : index
    %c0_0 = arith.constant 0 : index
    %0 = vector.load %arg1[%c0, %c0_0] : memref<16x32xf32, #tpu.memory_space<vmem>>, vector<16x32xf32>
    %cst = arith.constant dense<0.000000e+00> : vector<16xf32>
    %1 = vector.multi_reduction <add>, %0, %cst [1] : vector<16x32xf32> to vector<16xf32>
    %2 = vector.shape_cast %1 : vector<16xf32> to vector<16x1xf32>
    %cst_1 = arith.constant 3.200000e+01 : f32
    %3 = vector.broadcast %cst_1 : f32 to vector<16x1xf32>
    %4 = arith.divf %2, %3 : vector<16x1xf32>
    %5 = vector.broadcast %4 : vector<16x1xf32> to vector<16x32xf32>
    %6 = arith.subf %0, %5 : vector<16x32xf32>
    %7 = arith.mulf %6, %6 : vector<16x32xf32>
    %cst_2 = arith.constant dense<0.000000e+00> : vector<16xf32>
    %8 = vector.multi_reduction <add>, %7, %cst_2 [1] : vector<16x32xf32> to vector<16xf32>
    %9 = vector.shape_cast %8 : vector<16xf32> to vector<16x1xf32>
    %cst_3 = arith.constant 3.200000e+01 : f32
    %10 = vector.broadcast %cst_3 : f32 to vector<16x1xf32>
    %11 = arith.divf %9, %10 : vector<16x1xf32>
    %12 = vector.broadcast %4 : vector<16x1xf32> to vector<16x32xf32>
    %13 = arith.subf %0, %12 : vector<16x32xf32>
    %cst_4 = arith.constant 9.99999997E-7 : f32
    %14 = vector.broadcast %cst_4 : f32 to vector<16x1xf32>
    %15 = arith.addf %11, %14 : vector<16x1xf32>
    %16 = math.rsqrt %15 : vector<16x1xf32>
    %17 = vector.broadcast %16 : vector<16x1xf32> to vector<16x32xf32>
    %18 = arith.mulf %13, %17 : vector<16x32xf32>
    %c0_5 = arith.constant 0 : index
    %c0_6 = arith.constant 0 : index
    %19 = vector.load %arg2[%c0_5, %c0_6] : memref<1x32xf32, #tpu.memory_space<vmem>>, vector<1x32xf32>
    %20 = vector.broadcast %19 : vector<1x32xf32> to vector<16x32xf32>
    %21 = arith.mulf %18, %20 : vector<16x32xf32>
    %c0_7 = arith.constant 0 : index
    %c0_8 = arith.constant 0 : index
    %22 = vector.load %arg3[%c0_7, %c0_8] : memref<1x32xf32, #tpu.memory_space<vmem>>, vector<1x32xf32>
    %23 = vector.broadcast %22 : vector<1x32xf32> to vector<16x32xf32>
    %24 = arith.addf %21, %23 : vector<16x32xf32>
    %c0_9 = arith.constant 0 : index
    %c0_10 = arith.constant 0 : index
    %25 = vector.load %arg4[%c0_9, %c0_10] : memref<32x96xf32, #tpu.memory_space<vmem>>, vector<32x96xf32>
    %cst_11 = arith.constant dense<0.000000e+00> : vector<16x96xf32>
    %26 = tpu.matmul %24, %25, %cst_11 {dimension_numbers = #tpu.dot_dimension_numbers<[1], [0], [0], [1], [0, 0, 1, 1], [], []>, precision = #tpu.contract_precision<fp32>} : vector<16x32xf32>, vector<32x96xf32>, vector<16x96xf32> -> vector<16x96xf32>
    %c0_12 = arith.constant 0 : index
    %c0_13 = arith.constant 0 : index
    %27 = vector.load %arg5[%c0_12, %c0_13] : memref<16x96xf32, #tpu.memory_space<vmem>>, vector<16x96xf32>
    tpu.vector_store %arg5[%c0_12, %c0_13], %26 {strides = array<i32>} : memref<16x96xf32, #tpu.memory_space<vmem>>, vector<16x96xf32>,
    return
  }
  func.func @transform_0(%arg0: i32) -> (i32, i32) {
    %c0_i32 = arith.constant 0 : i32
    %c0_i32_0 = arith.constant 0 : i32
    return %arg0, %c0_i32 : i32, i32
  }
  func.func @transform_1(%arg0: i32) -> (i32, i32) {
    %c0_i32 = arith.constant 0 : i32
    %c0_i32_0 = arith.constant 0 : i32
    %c0_i32_1 = arith.constant 0 : i32
    return %c0_i32, %c0_i32_0 : i32, i32
  }
  func.func @transform_2(%arg0: i32) -> (i32, i32) {
    %c0_i32 = arith.constant 0 : i32
    %c0_i32_0 = arith.constant 0 : i32
    %c0_i32_1 = arith.constant 0 : i32
    return %c0_i32, %c0_i32_0 : i32, i32
  }
  func.func @transform_3(%arg0: i32) -> (i32, i32) {
    %c0_i32 = arith.constant 0 : i32
    %c0_i32_0 = arith.constant 0 : i32
    %c0_i32_1 = arith.constant 0 : i32
    return %c0_i32, %c0_i32_0 : i32, i32
  }
  func.func @transform_4(%arg0: i32) -> (i32, i32) {
    %c0_i32 = arith.constant 0 : i32
    %c0_i32_0 = arith.constant 0 : i32
    return %arg0, %c0_i32 : i32, i32
  }
}

</mosaic_0001>

<bundles_post_ra>
// kernel: tpu_custom_call.1
= control target key start
LH: loop header
LB: loop body
LE: loop exit
PB: predicated region body
PF: predicated region fallthrough
CT: control target
= control target key end

     0   :  { %9 = vsyncpa [#allocation3], 0  ;;  %s583_s0 = inlined_call_operand.hbm [shape: f32[16,32], index: 0, kind: input, shape index: {}]   ;;  %s584_s1 = inlined_call_operand.hbm [shape: f32[1,32], index: 1, kind: input, shape index: {}]   ;;  %s585_s2 = inlined_call_operand.vmem [shape: f32[1,32], index: 2, kind: input, shape index: {}]   ;;  %s586_s3 = inlined_call_operand.hbm [shape: f32[32,96], index: 3, kind: input, shape index: {}]   ;;  %s587_s4 = inlined_call_operand.hbm [shape: f32[16,96], index: 4, kind: output, shape index: {}]  }
   0x1   :  { %10 = vsyncpa [#allocation6], 0  ;;  %s30_s17 = sshll.u32 %s584_s1, 4  ;;  %s31_s17 = int_to_ptr.hbm [resolvable:$true] %s30_s17 }
   0x2   :  { %11 = vsyncpa [#allocation4], 0  ;;  %s503_s18 = smov [#allocation5]   ;;  %s16_s22 = sshll.u32 %s583_s0, 4  ;;  %s17_s22 = int_to_ptr.hbm [resolvable:$true] %s16_s22 }
   0x3   :  { %s32_s19 = sshll.u32 %s503_s18, 4  ;;  %s504_s23 = smov [#allocation2]   ;;  %s33_s19 = int_to_ptr.vmem [resolvable:$true] %s32_s19 }
   0x4   :  { %35 = dma.hbm_to_vmem [thread:$0]  %s31_s17, 16, %s33_s19, [#allocation6]  }
   0x5   :  { %s18_s24 = sshll.u32 %s504_s23, 4  ;;  %s505_s25 = smov 128   ;;  %s19_s24 = int_to_ptr.vmem [resolvable:$true] %s18_s24 }
   0x6   :  { %s506_s26 = smov 8   ;;  %s42_s28 = sshll.u32 %s586_s3, 4  ;;  %s43_s28 = int_to_ptr.hbm [resolvable:$true] %s42_s28 }
   0x7   :  { %24 = dma.hbm_to_vmem [thread:$0]  %s17_s22, 256, %s19_s24, [#allocation3], %s505_s25, %s505_s25, %s506_s26  }
   0x8   :  { %s507_s29 = smov [#allocation7]  }
   0x9   :  { %s44_s30 = sshll.u32 %s507_s29, 4  ;;  %s45_s30 = int_to_ptr.vmem [resolvable:$true] %s44_s30 }
   0xa   :  { %50 = dma.hbm_to_vmem [thread:$0]  %s43_s28, 512, %s45_s30, [#allocation6], %s505_s25, %s505_s25, %s506_s26  }
   0xb   :  { %497 = dma.done.wait [#allocation3], 256  }
   0xc   :  { %498 = vsyncadd [#allocation3], 4294967040 }
   0xd   :  { %499 = dma.done.wait [#allocation6], 528  }
   0xe   :  { %500 = vsyncadd [#allocation6], 4294966768  ;;  %vm65_vm0 = vcmask 261120   ;;  %v64_v0 = vld [vmem:[#allocation2 + $0x8] sm:$0xff]  ;;  %v63_v2 = vld [vmem:[#allocation2] sm:$0xff]  ;;  %v508_v4 = vmov 32.0  }
   0xf   :  { %v69_v1 = vsel %vm65_vm0, %v64_v0, 0.0  ;;  %v66_v3 = vsel %vm65_vm0, %v63_v2, 0.0  ;;  %395 = vrcp.f32 %v508_v4  ;;  %v132_v21 = vld [vmem:[#allocation7 + $0x18] sm:$0xff]  ;;  %v131_v23 = vld [vmem:[#allocation7 + $0x10] sm:$0xff]  ;;  %v130_v26 = vld [vmem:[#allocation7 + $0x8] sm:$0xff]  ;;  %vm355_vm8 = vcmask 785408  }
  0x10   :  { %70 = vadd.xlane.f32.xlu0 %v69_v1  ;;  %v151_v22 = vand.u32 4294901760, %v132_v21  ;;  %v153_v25 = vand.u32 4294901760, %v131_v23  ;;  %v155_v29 = vand.u32 4294901760, %v130_v26  ;;  %v129_v30 = vld [vmem:[#allocation7] sm:$0xff]  ;;  %v393_v59 = vld [vmem:[#allocation5] ss:$0 sm:$0xff] }
  0x11   :  { %v157_v34 = vand.u32 4294901760, %v129_v30  ;;  %v394_v63 = vld [vmem:[%s585_s2] ss:$0 sm:$0xff]  ;;  %s509_s2 = smov [#allocation8]   ;;  %s364_s8 = sshll.u32 %s587_s4, 4  ;;  %s365_s8 = int_to_ptr.hbm [resolvable:$true] %s364_s8 }
  0x12   :  { %v189_v24 = vsub.f32 %v132_v21, %v151_v22  ;;  %378 = vmatpush.msra.mxu2 %v151_v22  ;;  %152 = vmatpush.msra.mxu0 %v151_v22  ;;  %v195_v28 = vsub.f32 %v131_v23, %v153_v25  ;;  %v201_v33 = vsub.f32 %v130_v26, %v155_v29  ;;  %s362_s5 = sshll.u32 %s509_s2, 4  ;;  %s363_s5 = int_to_ptr.vmem [resolvable:$true] %s362_s5 }
  0x13   :  { %v207_v38 = vsub.f32 %v129_v30, %v157_v34 }
  0x14   :  { %v190_v27 = vand.u32 4294901760, %v189_v24  ;;  %379 = vmatpush.msra.mxu2 %v153_v25  ;;  %154 = vmatpush.msra.mxu0 %v153_v25  ;;  %v196_v32 = vand.u32 4294901760, %v195_v28  ;;  %v202_v37 = vand.u32 4294901760, %v201_v33 }
  0x15   :  { %v396_v5 = vpop.eup %395  ;;  %v208_v41 = vand.u32 4294901760, %v207_v38 }
  0x16   :  { %v73_v6 = vmul.f32 32.0, %v396_v5  ;;  %vm77_vm1 = vweird.f32 %v396_v5  ;;  %v191_v31 = vsub.f32 %v189_v24, %v190_v27  ;;  %380 = vmatpush.msra.mxu2 %v155_v29  ;;  %156 = vmatpush.msra.mxu0 %v155_v29  ;;  %v197_v36 = vsub.f32 %v195_v28, %v196_v32 }
  0x17   :  { %v203_v40 = vsub.f32 %v201_v33, %v202_v37  ;;  %v209_v43 = vsub.f32 %v207_v38, %v208_v41 }
  0x18   :  { %67 = vadd.xlane.f32.xlu0 %v66_v3  ;;  %v74_v7 = vsub.f32 1.0, %v73_v6  ;;  %v192_v35 = vand.u32 4294901760, %v191_v31  ;;  %381 = vmatpush.msra.mxu2 %v157_v34  ;;  %v198_v39 = vand.u32 4294901760, %v197_v36 }
  0x19   :  { %158 = vmatpush.msra.mxu0 %v157_v34  ;;  %v204_v42 = vand.u32 4294901760, %v203_v40  ;;  %v210_v44 = vand.u32 4294901760, %v209_v43 }
  0x1a   :  { %v75_v8 = vmul.f32 %v396_v5, %v74_v7  ;;  %235 = vmatpush.msrb.mxu2 %v189_v24  ;;  %382 = vmatpush.msra.mxu3 %v192_v35 }
  0x1b   :  { %304 = vmatpush.msrb.mxu0 %v190_v27  ;;  %193 = vmatpush.msra.mxu1 %v192_v35 }
  0x1c   :  { %v76_v9 = vadd.f32 %v396_v5, %v75_v8  ;;  %238 = vmatpush.msrb.mxu2 %v195_v28  ;;  %383 = vmatpush.msra.mxu3 %v198_v39 }
  0x1d   :  { %308 = vmatpush.msrb.mxu0 %v196_v32  ;;  %199 = vmatpush.msra.mxu1 %v198_v39 }
  0x1e   :  { %v552_v10 = vsel %vm77_vm1, %v396_v5, %v76_v9  ;;  %241 = vmatpush.msrb.mxu2 %v201_v33  ;;  %384 = vmatpush.msra.mxu3 %v204_v42 }
  0x1f   :  { %312 = vmatpush.msrb.mxu0 %v202_v37  ;;  %205 = vmatpush.msra.mxu1 %v204_v42 }
  0x20   :  { %244 = vmatpush.msrb.mxu2 %v207_v38  ;;  %385 = vmatpush.msra.mxu3 %v210_v44 }
  0x21   :  { %316 = vmatpush.msrb.mxu0 %v208_v41  ;;  %211 = vmatpush.msra.mxu1 %v210_v44 }
  0x22   :  { %269 = vmatpush.msrb.mxu3 %v151_v22 }
  0x23   :  { %339 = vmatpush.msrb.mxu1 %v151_v22 }
  0x24   :  { %271 = vmatpush.msrb.mxu3 %v153_v25 }
  0x25   :  { %341 = vmatpush.msrb.mxu1 %v153_v25 }
  0x26   :  { %273 = vmatpush.msrb.mxu3 %v155_v29 }
  0x27   :  { %343 = vmatpush.msrb.mxu1 %v155_v29 }
  0x28   :  { %275 = vmatpush.msrb.mxu3 %v157_v34 }
  0x29   :  { %345 = vmatpush.msrb.mxu1 %v157_v34 }
  0x83   :  { %v71_v11 = vpop.xlane.xlu0 %70 }
  0x84   :  { %v80_v12 = vmul.f32 %v552_v10, %v71_v11 }
  0x86   :  { %v555_v13 = vsub.f32 %v64_v0, %v80_v12 }
  0x88   :  { %v84_v14 = vmul.f32 %v555_v13, %v555_v13 }
  0x8a   :  { %v88_v15 = vsel %vm65_vm0, %v84_v14, 0.0 }
  0x8b   :  { %89 = vadd.xlane.f32.xlu1 %v88_v15  ;;  %v68_v16 = vpop.xlane.xlu0 %67 }
  0x8c   :  { %v79_v17 = vmul.f32 %v552_v10, %v68_v16 }
  0x8e   :  { %v561_v18 = vsub.f32 %v63_v2, %v79_v17 }
  0x90   :  { %v83_v19 = vmul.f32 %v561_v18, %v561_v18 }
  0x92   :  { %v85_v20 = vsel %vm65_vm0, %v83_v19, 0.0 }
  0x93   :  { %86 = vadd.xlane.f32.xlu1 %v85_v20 }
  0xfe   :  { %v90_v45 = vpop.xlane.xlu1 %89 }
  0xff   :  { %v92_v46 = vmul.f32 %v90_v45, %v552_v10 }
 0x101   :  { %v94_v47 = vadd.f32 1e-06, %v92_v46 }
 0x103   :  { %397 = vrsqrt.f32 %v94_v47  ;;  %vm111_vm3 = vweird.f32 %v94_v47 }
 0x106   :  { %v87_v48 = vpop.xlane.xlu1 %86 }
 0x107   :  { %v91_v49 = vmul.f32 %v87_v48, %v552_v10 }
 0x109   :  { %v398_v50 = vpop.eup %397  ;;  %v93_v51 = vadd.f32 1e-06, %v91_v49 }
 0x10a   :  { %v106_v52 = vmul.f32 %v398_v50, %v94_v47  ;;  %vm112_vm2 = vweird.f32 %v398_v50 }
 0x10b   :  { %399 = vrsqrt.f32 %v93_v51  ;;  %vm113_vm4 = vmor %vm111_vm3, %vm112_vm2  ;;  %vm101_vm6 = vweird.f32 %v93_v51 }
 0x10c   :  { %v107_v53 = vmul.f32 %v398_v50, %v106_v52 }
 0x10e   :  { %v108_v54 = vmul.f32 0.5, %v107_v53 }
 0x110   :  { %v109_v55 = vsub.f32 1.5, %v108_v54 }
 0x111   :  { %v400_v56 = vpop.eup %399 }
 0x112   :  { %v110_v57 = vmul.f32 %v398_v50, %v109_v55  ;;  %v96_v58 = vmul.f32 %v400_v56, %v93_v51  ;;  %vm102_vm5 = vweird.f32 %v400_v56 }
 0x113   :  { %vm103_vm7 = vmor %vm101_vm6, %vm102_vm5 }
 0x114   :  { %v114_v60 = vsel %vm113_vm4, %v398_v50, %v110_v57  ;;  %v97_v61 = vmul.f32 %v400_v56, %v96_v58 }
 0x115   :  { %v116_v62 = vmul.f32 %v114_v60, %v555_v13 }
 0x116   :  { %v98_v0 = vmul.f32 0.5, %v97_v61 }
 0x117   :  { %v122_v1 = vmul.f32 %v393_v59, %v116_v62 }
 0x118   :  { %v99_v2 = vsub.f32 1.5, %v98_v0 }
 0x119   :  { %v128_v3 = vadd.f32 %v394_v63, %v122_v1 }
 0x11a   :  { %v100_v4 = vmul.f32 %v400_v56, %v99_v2 }
 0x11b   :  { %v137_v5 = vsel %vm65_vm0, %v128_v3, 0 }
 0x11c   :  { %v104_v6 = vsel %vm103_vm7, %v400_v56, %v100_v4  ;;  %v167_v7 = vand.u32 4294901760, %v137_v5 }
 0x11d   :  { %v115_v8 = vmul.f32 %v104_v6, %v561_v18 }
 0x11e   :  { %217 = vmatmul.f32.vlgmr.msra.gmra.mxu3 %v167_v7  ;;  %v168_v9 = vsub.f32 %v137_v5, %v167_v7 }
 0x11f   :  { %v121_v10 = vmul.f32 %v393_v59, %v115_v8 }
 0x120   :  { %v169_v11 = vand.u32 4294901760, %v168_v9 }
 0x121   :  { %v127_v12 = vadd.f32 %v394_v63, %v121_v10 }
 0x122   :  { %v170_v13 = vsub.f32 %v168_v9, %v169_v11 }
 0x123   :  { %v134_v14 = vsel %vm65_vm0, %v127_v12, 0 }
 0x124   :  { %v171_v15 = vand.u32 4294901760, %v170_v13  ;;  %v159_v16 = vand.u32 4294901760, %v134_v14 }
 0x126   :  { %172 = vmatmul.f32.vlgmr.msra.gmra.mxu2 %v171_v15  ;;  %213 = vmatmul.f32.vlgmr.msra.gmra.mxu1 %v159_v16  ;;  %v160_v17 = vsub.f32 %v134_v14, %v159_v16 }
 0x128   :  { %v161_v19 = vand.u32 4294901760, %v160_v17 }
 0x12a   :  { %279 = vmatmul.f32.vlgmr.msrb.gmra.mxu3 %v161_v19  ;;  %v162_v20 = vsub.f32 %v160_v17, %v161_v19 }
 0x12c   :  { %v163_v21 = vand.u32 4294901760, %v162_v20 }
 0x12e   :  { %164 = vmatmul.f32.vlgmr.msra.gmra.mxu0 %v163_v21  ;;  %247 = vmatmul.f32.vlgmr.msrb.gmra.mxu2 %v160_v17 }
 0x12f   :  { %347 = vmatmul.f32.vlgmr.msrb.gmra.mxu1 %v159_v16 }
 0x132   :  { %285 = vmatmul.f32.gmra.mxu3 %v169_v11 }
 0x136   :  { %252 = vmatmul.f32.gmra.mxu2 %v168_v9  ;;  %318 = vmatmul.f32.vlgmr.msrb.gmra.mxu0 %v159_v16 }
 0x137   :  { %351 = vmatmul.f32.gmra.mxu1 %v167_v7 }
 0x13e   :  { %322 = vmatmul.f32.gmra.mxu0 %v167_v7 }
 0x1a1   :  { %v218_v18 = vpop.f32.mrf.mxu3 }
 0x1a3   :  { %v214_v23 = vpop.f32.mrf.mxu1 }
 0x1a9   :  { %v173_v22 = vpop.f32.mrf.mxu2 }
 0x1aa   :  { %v219_v33 = vadd.f32 %v218_v18, %v173_v22 }
 0x1ab   :  { %v165_v24 = vpop.f32.mrf.mxu0 }
 0x1ac   :  { %v215_v25 = vadd.f32 %v214_v23, %v165_v24  ;;  %v348_v31 = vpop.f32.mrf.mxu1 }
 0x1ad   :  { %v280_v26 = vpop.f32.mrf.mxu3 }
 0x1b1   :  { %v248_v27 = vpop.f32.mrf.mxu2 }
 0x1b2   :  { %v249_v28 = vadd.f32 %v248_v27, %v215_v25 }
 0x1b3   :  { %v319_v29 = vpop.f32.mrf.mxu0 }
 0x1b4   :  { %v281_v30 = vadd.f32 %v280_v26, %v249_v28  ;;  %v352_v41 = vpop.f32.mrf.mxu1 }
 0x1b5   :  { %v286_v37 = vpop.f32.mrf.mxu3 }
 0x1b6   :  { %v320_v32 = vadd.f32 %v319_v29, %v281_v30 }
 0x1b8   :  { %v349_v34 = vadd.f32 %v348_v31, %v320_v32 }
 0x1b9   :  { %v253_v35 = vpop.f32.mrf.mxu2 }
 0x1ba   :  { %v254_v36 = vadd.f32 %v253_v35, %v219_v33  ;;  %356 = vst.msk [vmem:[#allocation8] sm:$0xff] %vm355_vm8, %v349_v34 }
 0x1bb   :  { %v323_v39 = vpop.f32.mrf.mxu0 }
 0x1bc   :  { %v287_v38 = vadd.f32 %v286_v37, %v254_v36 }
 0x1be   :  { %v324_v40 = vadd.f32 %v323_v39, %v287_v38 }
 0x1c0   :  { %v353_v42 = vadd.f32 %v352_v41, %v324_v40 }
 0x1c2   :  { %357 = vst.msk [vmem:[#allocation8 + $0x8] sm:$0xff] %vm355_vm8, %v353_v42 }
 0x1c3   :  { %370 = dma.vmem_to_hbm [thread:$0]  %s363_s5, 256, %s365_s8, [#allocation4], %s505_s25, %s505_s25, %s506_s26  }
 0x1c4   :  { %501 = dma.done.wait [#allocation4], 256  }
 0x1c5   :  { %502 = vsyncadd [#allocation4], 4294967040 }
 0x1c6   :  { %375 = vsyncpa [#allocation3], 1 }
 0x1c7   :  { %376 = vsyncpa [#allocation6], 1 }
 0x1c8   :  { %377 = vsyncpa [#allocation4], 1 }

</bundles_post_ra>
